<compile_context>
chip_gen: v6e
topology: v6e:2x2x1
jax: 0.10.0
libtpu: 0.0.40
codegen_flags: <defaults>
</compile_context>

<pallas_src>
import jax
import jax.numpy as jnp
from jax import lax
from jax.experimental import pallas as pl
from jax.experimental.pallas import tpu as pltpu

EPS = 1e-5

# Packed-parameter column layout (single (2, 26) VMEM operand, row = channel):
#   0..4   w1[o, k]           5  b1[o]        6  gamma1 (dup)   7  beta1 (dup)
#   8..13  w2[o, 3*c + k]     14 b2[o]        15 gamma2[c]      16 beta2[c]
#   17..22 w3[o, 3*c + k]     23 b3[o]        24 gamma3[c]      25 beta3[c]


def gender_kernel(x_ref, wp_ref, out_ref):
    # Shapes are fully recoverable from the refs (no static partials needed).
    N1 = x_ref.shape[1]          # B * P1   (P1 = L // 10, stage-1 pooled length)
    B = out_ref.shape[1]
    M = N1 // 6                  # B * P2   (P2 = L // 60, stage-2 pooled length)
    P2 = M // B
    Lc = P2 - 2                  # conv-3 output length (stride 1, k=3)
    P3 = Lc // 2                 # pool-3 / mean length

    x = x_ref[...]               # (10, N1) f32, taps-major, lane-dense
    wp = wp_ref[...]             # (2, 26)  f32 packed params

    # ---------------- Stage 1: BN1 -> Conv1d(1->2,k=5,s=5) -> ReLU -> MaxPool(2,2)
    # BN1 has a single channel: stats over ALL of x; fold scale/shift into weights.
    n1 = float(10 * N1)          # == B * L
    s1 = jnp.sum(x)
    ss1 = jnp.sum(x * x)
    mu1 = s1 / n1
    var1 = jnp.maximum(ss1 / n1 - mu1 * mu1, 0.0)
    inv1 = lax.rsqrt(var1 + EPS)
    scale1 = inv1 * wp[:, 6:7]                    # (2,1) (gamma duplicated per row)
    shift1 = wp[:, 7:8] - mu1 * scale1            # (2,1)

    w1 = wp[:, 0:5]                               # (2,5) raw conv-1 weights
    w1f = w1 * scale1                             # BN folded into weights
    bf1 = wp[:, 5:6] + shift1 * jnp.sum(w1, axis=1, keepdims=True)

    def conv1_window(j):                          # j = stage-1 pool window
        acc = w1f[:, 0:1] * x[5 * j:5 * j + 1, :]
        for k in range(1, 5):                     # conv taps = whole rows of x
            acc = acc + w1f[:, k:k + 1] * x[5 * j + k:5 * j + k + 1, :]
        return jnp.maximum(acc + bf1, 0.0)        # (2, N1) ReLU

    z1 = jnp.maximum(conv1_window(0), conv1_window(1))   # (2, N1); pool-1

    # ---------------- Stage 2: BN2 -> Conv1d(2->2,k=3,s=3) -> ReLU -> MaxPool(2,2)
    n2 = float(N1)
    st2 = jnp.concatenate([z1, z1 * z1], axis=0)          # fused sum / sum-sq
    red2 = jnp.sum(st2, axis=1, keepdims=True)             # (4,1)
    mu2 = red2[0:2] / n2
    var2 = jnp.maximum(red2[2:4] / n2 - mu2 * mu2, 0.0)
    scale2 = lax.rsqrt(var2 + EPS) * wp[:, 15:16]
    shift2 = wp[:, 16:17] - mu2 * scale2
    z1n = z1 * scale2 + shift2                              # (2, N1) normalized

    def conv2_window(j2):                        # j2 = stage-2 pool window
        acc = None
        for c in range(2):                       # input channel (sublane row of z1n)
            for k2 in range(3):                  # conv-2 tap = contiguous lane block
                g = 3 * j2 + k2
                t = wp[:, 8 + 3 * c + k2:9 + 3 * c + k2] * \
                    z1n[c:c + 1, g * M:(g + 1) * M]
                acc = t if acc is None else acc + t
        return jnp.maximum(acc + wp[:, 14:15], 0.0)         # (2, M)

    z2 = jnp.maximum(conv2_window(0), conv2_window(1))      # (2, M); col = p2*B + b

    # ---------------- Stage 3: BN3 -> Conv1d(2->2,k=3,s=1) -> ReLU -> MaxPool(2,2) -> mean
    n3 = float(M)
    st3 = jnp.concatenate([z2, z2 * z2], axis=0)
    red3 = jnp.sum(st3, axis=1, keepdims=True)
    mu3 = red3[0:2] / n3
    var3 = jnp.maximum(red3[2:4] / n3 - mu3 * mu3, 0.0)
    scale3 = lax.rsqrt(var3 + EPS) * wp[:, 24:25]
    shift3 = wp[:, 25:26] - mu3 * scale3
    z2n = z2 * scale3 + shift3                               # (2, M)

    acc = None
    for c in range(2):
        for k in range(3):                       # stride-1 conv = shifted lane block
            t = wp[:, 17 + 3 * c + k:18 + 3 * c + k] * \
                z2n[c:c + 1, k * B:k * B + Lc * B]
            acc = t if acc is None else acc + t
    conv3 = jnp.maximum(acc + wp[:, 23:24], 0.0)             # (2, Lc*B)

    tot = None
    for s in range(P3):                          # independent (2,B) maxima, one sum
        pooled = jnp.maximum(conv3[:, (2 * s) * B:(2 * s + 1) * B],
                             conv3[:, (2 * s + 1) * B:(2 * s + 2) * B])
        tot = pooled if tot is None else tot + pooled
    out_ref[...] = tot * (1.0 / float(P3))       # single (2, B) store


# -----------------------------------------------------------------------------
# Wrapper
# -----------------------------------------------------------------------------
def gender_classify_forward(x, p):
    """x: (B, 1, L) float32, NCL like PyTorch.  Returns (B, 2)."""
    B, C, L = x.shape
    assert C == 1
    # Exact-divisibility constraints of the conv/pool cascade at these sizes.
    assert L % 60 == 0 and (L // 60) >= 4, "L must be a multiple of 60 (>= 240)"
    P2 = L // 60
    N1 = 6 * B * P2              # = B * (L // 10)
    f32 = jnp.float32
    x = x.astype(f32)

    # Lane-dense taps-major layout (tiny wrapper-side transpose, ~KBs):
    #   row  = j*5 + k                          (stage-1 window / tap)
    #   col  = (3*j2 + k2)*(B*P2) + p2*B + b    (stage-2 tap blocks, then p2, then b)
    x_t = x.reshape(B, P2, 6, 2, 5).transpose(3, 4, 2, 1, 0).reshape(10, N1)

    # One packed (2, 26) parameter operand (single DMA, single padded tile).
    dup = lambda v: jnp.broadcast_to(v.reshape(1, 1), (2, 1))
    wp = jnp.concatenate([
        p["w1"][:, 0, :],                 # 0..4
        p["b1"].reshape(2, 1),            # 5
        dup(p["g1"]), dup(p["be1"]),      # 6, 7
        p["w2"].reshape(2, 6),            # 8..13
        p["b2"].reshape(2, 1),            # 14
        p["g2"].reshape(2, 1),            # 15
        p["be2"].reshape(2, 1),           # 16
        p["w3"].reshape(2, 6),            # 17..22
        p["b3"].reshape(2, 1),            # 23
        p["g3"].reshape(2, 1),            # 24
        p["be3"].reshape(2, 1),           # 25
    ], axis=1).astype(f32)

    vmem = pl.BlockSpec(memory_space=pltpu.MemorySpace.VMEM)
    out = pl.pallas_call(
        gender_kernel,
        out_shape=jax.ShapeDtypeStruct((2, B), f32),
        in_specs=[vmem, vmem],
        out_specs=vmem,
    )(x_t, wp)
    return out.T                                  # (B, 2)


# -----------------------------------------------------------------------------
# Pure-JAX reference (correctness check)
# -----------------------------------------------------------------------------
def reference(x, p):
    def bn(v, g, b):
        mu = v.mean(axis=(0, 2), keepdims=True)
        var = ((v - mu) ** 2).mean(axis=(0, 2), keepdims=True)
        return (v - mu) / jnp.sqrt(var + EPS) * g.reshape(1, -1, 1) + b.reshape(1, -1, 1)

    def conv(v, w, b, s):
        y = lax.conv_general_dilated(v, w, (s,), "VALID",
                                     dimension_numbers=("NCH", "OIH", "NCH"))
        return y + b.reshape(1, -1, 1)

    def pool(v):
        Lp = v.shape[-1] // 2
        return v[..., :Lp * 2].reshape(v.shape[0], v.shape[1], Lp, 2).max(-1)

    h = pool(jax.nn.relu(conv(bn(x, p["g1"], p["be1"]), p["w1"], p["b1"], 5)))
    h = pool(jax.nn.relu(conv(bn(h, p["g2"], p["be2"]), p["w2"], p["b2"], 3)))
    h = pool(jax.nn.relu(conv(bn(h, p["g3"], p["be3"]), p["w3"], p["b3"], 1)))
    return h.mean(-1)


# -----------------------------------------------------------------------------
def make_params(key):
    ks = jax.random.split(key, 12)
    f32 = jnp.float32
    return {
        "w1": (0.3 * jax.random.normal(ks[0], (2, 1, 5))).astype(f32),
        "b1": (0.1 * jax.random.normal(ks[1], (2,))).astype(f32),
        "w2": (0.3 * jax.random.normal(ks[2], (2, 2, 3))).astype(f32),
        "b2": (0.1 * jax.random.normal(ks[3], (2,))).astype(f32),
        "w3": (0.3 * jax.random.normal(ks[4], (2, 2, 3))).astype(f32),
        "b3": (0.1 * jax.random.normal(ks[5], (2,))).astype(f32),
        "g1": (1.0 + 0.1 * jax.random.normal(ks[6], (1,))).astype(f32),
        "be1": (0.05 * jax.random.normal(ks[7], (1,))).astype(f32),
        "g2": (1.0 + 0.1 * jax.random.normal(ks[8], (2,))).astype(f32),
        "be2": (0.05 * jax.random.normal(ks[9], (2,))).astype(f32),
        "g3": (1.0 + 0.1 * jax.random.normal(ks[10], (2,))).astype(f32),
        "be3": (0.05 * jax.random.normal(ks[11], (2,))).astype(f32),
    }


if __name__ == "__main__":
    key = jax.random.PRNGKey(0)
    kx, kp = jax.random.split(key)

    B, L = 4, 480                       # 480 -> 96 -> 48 -> 16 -> 8 -> 6 -> 3
    x = jax.random.normal(kx, (B, 1, L), dtype=jnp.float32)
    params = make_params(kp)

    fwd = jax.jit(gender_classify_forward)
    out = jax.block_until_ready(fwd(x, params))
    ref = jax.block_until_ready(reference(x, params))

    assert out.shape == (B, 2), out.shape
    assert jnp.allclose(out, ref, rtol=1e-4, atol=1e-4), (out, ref)
    print("KERNEL_OK")
</pallas_src>

<mosaic_0001>
module attributes {stable_mosaic.version = 11 : i64} {
  func.func @gender_kernel(%arg0: memref<10x192xf32, #tpu.memory_space<vmem>>, %arg1: memref<2x26xf32, #tpu.memory_space<vmem>>, %arg2: memref<2x4xf32, #tpu.memory_space<vmem>>) attributes {dimension_semantics = [], scalar_prefetch = 0 : i64, scratch_operands = 0 : i64, tpu.core_type = #tpu.core_type<tc>} {
    %c0 = arith.constant 0 : index
    %c0_0 = arith.constant 0 : index
    %0 = vector.load %arg0[%c0, %c0_0] : memref<10x192xf32, #tpu.memory_space<vmem>>, vector<10x192xf32>
    %c0_1 = arith.constant 0 : index
    %c0_2 = arith.constant 0 : index
    %1 = vector.load %arg1[%c0_1, %c0_2] : memref<2x26xf32, #tpu.memory_space<vmem>>, vector<2x26xf32>
    %2 = vector.shape_cast %0 : vector<10x192xf32> to vector<1x10x192xf32>
    %cst = arith.constant dense<0.000000e+00> : vector<1xf32>
    %3 = vector.multi_reduction <add>, %2, %cst [1, 2] : vector<1x10x192xf32> to vector<1xf32>
    %4 = vector.shape_cast %3 : vector<1xf32> to vector<1x1x1xf32>
    %5 = vector.extract %4[0, 0, 0] : f32 from vector<1x1x1xf32>
    %6 = arith.mulf %0, %0 : vector<10x192xf32>
    %7 = vector.shape_cast %6 : vector<10x192xf32> to vector<1x10x192xf32>
    %cst_3 = arith.constant dense<0.000000e+00> : vector<1xf32>
    %8 = vector.multi_reduction <add>, %7, %cst_3 [1, 2] : vector<1x10x192xf32> to vector<1xf32>
    %9 = vector.shape_cast %8 : vector<1xf32> to vector<1x1x1xf32>
    %10 = vector.extract %9[0, 0, 0] : f32 from vector<1x1x1xf32>
    %cst_4 = arith.constant 1.920000e+03 : f32
    %11 = arith.divf %5, %cst_4 : f32
    %cst_5 = arith.constant 1.920000e+03 : f32
    %12 = arith.divf %10, %cst_5 : f32
    %13 = arith.mulf %11, %11 : f32
    %14 = arith.subf %12, %13 : f32
    %cst_6 = arith.constant 0.000000e+00 : f32
    %15 = arith.maximumf %14, %cst_6 : f32
    %cst_7 = arith.constant 9.99999974E-6 : f32
    %16 = arith.addf %15, %cst_7 : f32
    %17 = math.rsqrt %16 : f32
    %18 = vector.extract_strided_slice %1 {offsets = [0, 6], sizes = [2, 1], strides = [1, 1]} : vector<2x26xf32> to vector<2x1xf32>
    %19 = vector.broadcast %17 : f32 to vector<2x1xf32>
    %20 = arith.mulf %19, %18 : vector<2x1xf32>
    %21 = vector.extract_strided_slice %1 {offsets = [0, 7], sizes = [2, 1], strides = [1, 1]} : vector<2x26xf32> to vector<2x1xf32>
    %22 = vector.broadcast %11 : f32 to vector<2x1xf32>
    %23 = arith.mulf %22, %20 : vector<2x1xf32>
    %24 = arith.subf %21, %23 : vector<2x1xf32>
    %25 = vector.extract_strided_slice %1 {offsets = [0, 0], sizes = [2, 5], strides = [1, 1]} : vector<2x26xf32> to vector<2x5xf32>
    %26 = vector.broadcast %20 : vector<2x1xf32> to vector<2x5xf32>
    %27 = arith.mulf %25, %26 : vector<2x5xf32>
    %28 = vector.extract_strided_slice %1 {offsets = [0, 5], sizes = [2, 1], strides = [1, 1]} : vector<2x26xf32> to vector<2x1xf32>
    %cst_8 = arith.constant dense<0.000000e+00> : vector<2xf32>
    %29 = vector.multi_reduction <add>, %25, %cst_8 [1] : vector<2x5xf32> to vector<2xf32>
    %30 = vector.shape_cast %29 : vector<2xf32> to vector<2x1xf32>
    %31 = arith.mulf %24, %30 : vector<2x1xf32>
    %32 = arith.addf %28, %31 : vector<2x1xf32>
    %33 = vector.extract_strided_slice %27 {offsets = [0, 0], sizes = [2, 1], strides = [1, 1]} : vector<2x5xf32> to vector<2x1xf32>
    %34 = vector.extract_strided_slice %0 {offsets = [0, 0], sizes = [1, 192], strides = [1, 1]} : vector<10x192xf32> to vector<1x192xf32>
    %35 = vector.broadcast %33 : vector<2x1xf32> to vector<2x192xf32>
    %36 = vector.broadcast %34 : vector<1x192xf32> to vector<2x192xf32>
    %37 = arith.mulf %35, %36 : vector<2x192xf32>
    %38 = vector.extract_strided_slice %27 {offsets = [0, 1], sizes = [2, 1], strides = [1, 1]} : vector<2x5xf32> to vector<2x1xf32>
    %39 = vector.extract_strided_slice %0 {offsets = [1, 0], sizes = [1, 192], strides = [1, 1]} : vector<10x192xf32> to vector<1x192xf32>
    %40 = vector.broadcast %38 : vector<2x1xf32> to vector<2x192xf32>
    %41 = vector.broadcast %39 : vector<1x192xf32> to vector<2x192xf32>
    %42 = arith.mulf %40, %41 : vector<2x192xf32>
    %43 = arith.addf %37, %42 : vector<2x192xf32>
    %44 = vector.extract_strided_slice %27 {offsets = [0, 2], sizes = [2, 1], strides = [1, 1]} : vector<2x5xf32> to vector<2x1xf32>
    %45 = vector.extract_strided_slice %0 {offsets = [2, 0], sizes = [1, 192], strides = [1, 1]} : vector<10x192xf32> to vector<1x192xf32>
    %46 = vector.broadcast %44 : vector<2x1xf32> to vector<2x192xf32>
    %47 = vector.broadcast %45 : vector<1x192xf32> to vector<2x192xf32>
    %48 = arith.mulf %46, %47 : vector<2x192xf32>
    %49 = arith.addf %43, %48 : vector<2x192xf32>
    %50 = vector.extract_strided_slice %27 {offsets = [0, 3], sizes = [2, 1], strides = [1, 1]} : vector<2x5xf32> to vector<2x1xf32>
    %51 = vector.extract_strided_slice %0 {offsets = [3, 0], sizes = [1, 192], strides = [1, 1]} : vector<10x192xf32> to vector<1x192xf32>
    %52 = vector.broadcast %50 : vector<2x1xf32> to vector<2x192xf32>
    %53 = vector.broadcast %51 : vector<1x192xf32> to vector<2x192xf32>
    %54 = arith.mulf %52, %53 : vector<2x192xf32>
    %55 = arith.addf %49, %54 : vector<2x192xf32>
    %56 = vector.extract_strided_slice %27 {offsets = [0, 4], sizes = [2, 1], strides = [1, 1]} : vector<2x5xf32> to vector<2x1xf32>
    %57 = vector.extract_strided_slice %0 {offsets = [4, 0], sizes = [1, 192], strides = [1, 1]} : vector<10x192xf32> to vector<1x192xf32>
    %58 = vector.broadcast %56 : vector<2x1xf32> to vector<2x192xf32>
    %59 = vector.broadcast %57 : vector<1x192xf32> to vector<2x192xf32>
    %60 = arith.mulf %58, %59 : vector<2x192xf32>
    %61 = arith.addf %55, %60 : vector<2x192xf32>
    %62 = vector.broadcast %32 : vector<2x1xf32> to vector<2x192xf32>
    %63 = arith.addf %61, %62 : vector<2x192xf32>
    %cst_9 = arith.constant 0.000000e+00 : f32
    %64 = vector.broadcast %cst_9 : f32 to vector<2x192xf32>
    %65 = arith.maximumf %63, %64 : vector<2x192xf32>
    %66 = vector.extract_strided_slice %27 {offsets = [0, 0], sizes = [2, 1], strides = [1, 1]} : vector<2x5xf32> to vector<2x1xf32>
    %67 = vector.extract_strided_slice %0 {offsets = [5, 0], sizes = [1, 192], strides = [1, 1]} : vector<10x192xf32> to vector<1x192xf32>
    %68 = vector.broadcast %66 : vector<2x1xf32> to vector<2x192xf32>
    %69 = vector.broadcast %67 : vector<1x192xf32> to vector<2x192xf32>
    %70 = arith.mulf %68, %69 : vector<2x192xf32>
    %71 = vector.extract_strided_slice %27 {offsets = [0, 1], sizes = [2, 1], strides = [1, 1]} : vector<2x5xf32> to vector<2x1xf32>
    %72 = vector.extract_strided_slice %0 {offsets = [6, 0], sizes = [1, 192], strides = [1, 1]} : vector<10x192xf32> to vector<1x192xf32>
    %73 = vector.broadcast %71 : vector<2x1xf32> to vector<2x192xf32>
    %74 = vector.broadcast %72 : vector<1x192xf32> to vector<2x192xf32>
    %75 = arith.mulf %73, %74 : vector<2x192xf32>
    %76 = arith.addf %70, %75 : vector<2x192xf32>
    %77 = vector.extract_strided_slice %27 {offsets = [0, 2], sizes = [2, 1], strides = [1, 1]} : vector<2x5xf32> to vector<2x1xf32>
    %78 = vector.extract_strided_slice %0 {offsets = [7, 0], sizes = [1, 192], strides = [1, 1]} : vector<10x192xf32> to vector<1x192xf32>
    %79 = vector.broadcast %77 : vector<2x1xf32> to vector<2x192xf32>
    %80 = vector.broadcast %78 : vector<1x192xf32> to vector<2x192xf32>
    %81 = arith.mulf %79, %80 : vector<2x192xf32>
    %82 = arith.addf %76, %81 : vector<2x192xf32>
    %83 = vector.extract_strided_slice %27 {offsets = [0, 3], sizes = [2, 1], strides = [1, 1]} : vector<2x5xf32> to vector<2x1xf32>
    %84 = vector.extract_strided_slice %0 {offsets = [8, 0], sizes = [1, 192], strides = [1, 1]} : vector<10x192xf32> to vector<1x192xf32>
    %85 = vector.broadcast %83 : vector<2x1xf32> to vector<2x192xf32>
    %86 = vector.broadcast %84 : vector<1x192xf32> to vector<2x192xf32>
    %87 = arith.mulf %85, %86 : vector<2x192xf32>
    %88 = arith.addf %82, %87 : vector<2x192xf32>
    %89 = vector.extract_strided_slice %27 {offsets = [0, 4], sizes = [2, 1], strides = [1, 1]} : vector<2x5xf32> to vector<2x1xf32>
    %90 = vector.extract_strided_slice %0 {offsets = [9, 0], sizes = [1, 192], strides = [1, 1]} : vector<10x192xf32> to vector<1x192xf32>
    %91 = vector.broadcast %89 : vector<2x1xf32> to vector<2x192xf32>
    %92 = vector.broadcast %90 : vector<1x192xf32> to vector<2x192xf32>
    %93 = arith.mulf %91, %92 : vector<2x192xf32>
    %94 = arith.addf %88, %93 : vector<2x192xf32>
    %95 = vector.broadcast %32 : vector<2x1xf32> to vector<2x192xf32>
    %96 = arith.addf %94, %95 : vector<2x192xf32>
    %cst_10 = arith.constant 0.000000e+00 : f32
    %97 = vector.broadcast %cst_10 : f32 to vector<2x192xf32>
    %98 = arith.maximumf %96, %97 : vector<2x192xf32>
    %99 = arith.maximumf %65, %98 : vector<2x192xf32>
    %100 = arith.mulf %99, %99 : vector<2x192xf32>
    %101 = tpu.concatenate %99, %100 in 0 : vector<2x192xf32>, vector<2x192xf32> -> vector<4x192xf32>
    %cst_11 = arith.constant dense<0.000000e+00> : vector<4xf32>
    %102 = vector.multi_reduction <add>, %101, %cst_11 [1] : vector<4x192xf32> to vector<4xf32>
    %103 = vector.shape_cast %102 : vector<4xf32> to vector<4x1xf32>
    %104 = vector.extract_strided_slice %103 {offsets = [0, 0], sizes = [2, 1], strides = [1, 1]} : vector<4x1xf32> to vector<2x1xf32>
    %cst_12 = arith.constant 1.920000e+02 : f32
    %105 = vector.broadcast %cst_12 : f32 to vector<2x1xf32>
    %106 = arith.divf %104, %105 : vector<2x1xf32>
    %107 = vector.extract_strided_slice %103 {offsets = [2, 0], sizes = [2, 1], strides = [1, 1]} : vector<4x1xf32> to vector<2x1xf32>
    %cst_13 = arith.constant 1.920000e+02 : f32
    %108 = vector.broadcast %cst_13 : f32 to vector<2x1xf32>
    %109 = arith.divf %107, %108 : vector<2x1xf32>
    %110 = arith.mulf %106, %106 : vector<2x1xf32>
    %111 = arith.subf %109, %110 : vector<2x1xf32>
    %cst_14 = arith.constant 0.000000e+00 : f32
    %112 = vector.broadcast %cst_14 : f32 to vector<2x1xf32>
    %113 = arith.maximumf %111, %112 : vector<2x1xf32>
    %cst_15 = arith.constant 9.99999974E-6 : f32
    %114 = vector.broadcast %cst_15 : f32 to vector<2x1xf32>
    %115 = arith.addf %113, %114 : vector<2x1xf32>
    %116 = math.rsqrt %115 : vector<2x1xf32>
    %117 = vector.extract_strided_slice %1 {offsets = [0, 15], sizes = [2, 1], strides = [1, 1]} : vector<2x26xf32> to vector<2x1xf32>
    %118 = arith.mulf %116, %117 : vector<2x1xf32>
    %119 = vector.extract_strided_slice %1 {offsets = [0, 16], sizes = [2, 1], strides = [1, 1]} : vector<2x26xf32> to vector<2x1xf32>
    %120 = arith.mulf %106, %118 : vector<2x1xf32>
    %121 = arith.subf %119, %120 : vector<2x1xf32>
    %122 = vector.broadcast %118 : vector<2x1xf32> to vector<2x192xf32>
    %123 = arith.mulf %99, %122 : vector<2x192xf32>
    %124 = vector.broadcast %121 : vector<2x1xf32> to vector<2x192xf32>
    %125 = arith.addf %123, %124 : vector<2x192xf32>
    %126 = vector.extract_strided_slice %1 {offsets = [0, 8], sizes = [2, 1], strides = [1, 1]} : vector<2x26xf32> to vector<2x1xf32>
    %127 = vector.extract_strided_slice %125 {offsets = [0, 0], sizes = [1, 32], strides = [1, 1]} : vector<2x192xf32> to vector<1x32xf32>
    %128 = vector.broadcast %126 : vector<2x1xf32> to vector<2x32xf32>
    %129 = vector.broadcast %127 : vector<1x32xf32> to vector<2x32xf32>
    %130 = arith.mulf %128, %129 : vector<2x32xf32>
    %131 = vector.extract_strided_slice %1 {offsets = [0, 9], sizes = [2, 1], strides = [1, 1]} : vector<2x26xf32> to vector<2x1xf32>
    %132 = vector.extract_strided_slice %125 {offsets = [0, 32], sizes = [1, 32], strides = [1, 1]} : vector<2x192xf32> to vector<1x32xf32>
    %133 = vector.broadcast %131 : vector<2x1xf32> to vector<2x32xf32>
    %134 = vector.broadcast %132 : vector<1x32xf32> to vector<2x32xf32>
    %135 = arith.mulf %133, %134 : vector<2x32xf32>
    %136 = arith.addf %130, %135 : vector<2x32xf32>
    %137 = vector.extract_strided_slice %1 {offsets = [0, 10], sizes = [2, 1], strides = [1, 1]} : vector<2x26xf32> to vector<2x1xf32>
    %138 = vector.extract_strided_slice %125 {offsets = [0, 64], sizes = [1, 32], strides = [1, 1]} : vector<2x192xf32> to vector<1x32xf32>
    %139 = vector.broadcast %137 : vector<2x1xf32> to vector<2x32xf32>
    %140 = vector.broadcast %138 : vector<1x32xf32> to vector<2x32xf32>
    %141 = arith.mulf %139, %140 : vector<2x32xf32>
    %142 = arith.addf %136, %141 : vector<2x32xf32>
    %143 = vector.extract_strided_slice %1 {offsets = [0, 11], sizes = [2, 1], strides = [1, 1]} : vector<2x26xf32> to vector<2x1xf32>
    %144 = vector.extract_strided_slice %125 {offsets = [1, 0], sizes = [1, 32], strides = [1, 1]} : vector<2x192xf32> to vector<1x32xf32>
    %145 = vector.broadcast %143 : vector<2x1xf32> to vector<2x32xf32>
    %146 = vector.broadcast %144 : vector<1x32xf32> to vector<2x32xf32>
    %147 = arith.mulf %145, %146 : vector<2x32xf32>
    %148 = arith.addf %142, %147 : vector<2x32xf32>
    %149 = vector.extract_strided_slice %1 {offsets = [0, 12], sizes = [2, 1], strides = [1, 1]} : vector<2x26xf32> to vector<2x1xf32>
    %150 = vector.extract_strided_slice %125 {offsets = [1, 32], sizes = [1, 32], strides = [1, 1]} : vector<2x192xf32> to vector<1x32xf32>
    %151 = vector.broadcast %149 : vector<2x1xf32> to vector<2x32xf32>
    %152 = vector.broadcast %150 : vector<1x32xf32> to vector<2x32xf32>
    %153 = arith.mulf %151, %152 : vector<2x32xf32>
    %154 = arith.addf %148, %153 : vector<2x32xf32>
    %155 = vector.extract_strided_slice %1 {offsets = [0, 13], sizes = [2, 1], strides = [1, 1]} : vector<2x26xf32> to vector<2x1xf32>
    %156 = vector.extract_strided_slice %125 {offsets = [1, 64], sizes = [1, 32], strides = [1, 1]} : vector<2x192xf32> to vector<1x32xf32>
    %157 = vector.broadcast %155 : vector<2x1xf32> to vector<2x32xf32>
    %158 = vector.broadcast %156 : vector<1x32xf32> to vector<2x32xf32>
    %159 = arith.mulf %157, %158 : vector<2x32xf32>
    %160 = arith.addf %154, %159 : vector<2x32xf32>
    %161 = vector.extract_strided_slice %1 {offsets = [0, 14], sizes = [2, 1], strides = [1, 1]} : vector<2x26xf32> to vector<2x1xf32>
    %162 = vector.broadcast %161 : vector<2x1xf32> to vector<2x32xf32>
    %163 = arith.addf %160, %162 : vector<2x32xf32>
    %cst_16 = arith.constant 0.000000e+00 : f32
    %164 = vector.broadcast %cst_16 : f32 to vector<2x32xf32>
    %165 = arith.maximumf %163, %164 : vector<2x32xf32>
    %166 = vector.extract_strided_slice %1 {offsets = [0, 8], sizes = [2, 1], strides = [1, 1]} : vector<2x26xf32> to vector<2x1xf32>
    %167 = vector.extract_strided_slice %125 {offsets = [0, 96], sizes = [1, 32], strides = [1, 1]} : vector<2x192xf32> to vector<1x32xf32>
    %168 = vector.broadcast %166 : vector<2x1xf32> to vector<2x32xf32>
    %169 = vector.broadcast %167 : vector<1x32xf32> to vector<2x32xf32>
    %170 = arith.mulf %168, %169 : vector<2x32xf32>
    %171 = vector.extract_strided_slice %1 {offsets = [0, 9], sizes = [2, 1], strides = [1, 1]} : vector<2x26xf32> to vector<2x1xf32>
    %172 = vector.extract_strided_slice %125 {offsets = [0, 128], sizes = [1, 32], strides = [1, 1]} : vector<2x192xf32> to vector<1x32xf32>
    %173 = vector.broadcast %171 : vector<2x1xf32> to vector<2x32xf32>
    %174 = vector.broadcast %172 : vector<1x32xf32> to vector<2x32xf32>
    %175 = arith.mulf %173, %174 : vector<2x32xf32>
    %176 = arith.addf %170, %175 : vector<2x32xf32>
    %177 = vector.extract_strided_slice %1 {offsets = [0, 10], sizes = [2, 1], strides = [1, 1]} : vector<2x26xf32> to vector<2x1xf32>
    %178 = vector.extract_strided_slice %125 {offsets = [0, 160], sizes = [1, 32], strides = [1, 1]} : vector<2x192xf32> to vector<1x32xf32>
    %179 = vector.broadcast %177 : vector<2x1xf32> to vector<2x32xf32>
    %180 = vector.broadcast %178 : vector<1x32xf32> to vector<2x32xf32>
    %181 = arith.mulf %179, %180 : vector<2x32xf32>
    %182 = arith.addf %176, %181 : vector<2x32xf32>
    %183 = vector.extract_strided_slice %1 {offsets = [0, 11], sizes = [2, 1], strides = [1, 1]} : vector<2x26xf32> to vector<2x1xf32>
    %184 = vector.extract_strided_slice %125 {offsets = [1, 96], sizes = [1, 32], strides = [1, 1]} : vector<2x192xf32> to vector<1x32xf32>
    %185 = vector.broadcast %183 : vector<2x1xf32> to vector<2x32xf32>
    %186 = vector.broadcast %184 : vector<1x32xf32> to vector<2x32xf32>
    %187 = arith.mulf %185, %186 : vector<2x32xf32>
    %188 = arith.addf %182, %187 : vector<2x32xf32>
    %189 = vector.extract_strided_slice %1 {offsets = [0, 12], sizes = [2, 1], strides = [1, 1]} : vector<2x26xf32> to vector<2x1xf32>
    %190 = vector.extract_strided_slice %125 {offsets = [1, 128], sizes = [1, 32], strides = [1, 1]} : vector<2x192xf32> to vector<1x32xf32>
    %191 = vector.broadcast %189 : vector<2x1xf32> to vector<2x32xf32>
    %192 = vector.broadcast %190 : vector<1x32xf32> to vector<2x32xf32>
    %193 = arith.mulf %191, %192 : vector<2x32xf32>
    %194 = arith.addf %188, %193 : vector<2x32xf32>
    %195 = vector.extract_strided_slice %1 {offsets = [0, 13], sizes = [2, 1], strides = [1, 1]} : vector<2x26xf32> to vector<2x1xf32>
    %196 = vector.extract_strided_slice %125 {offsets = [1, 160], sizes = [1, 32], strides = [1, 1]} : vector<2x192xf32> to vector<1x32xf32>
    %197 = vector.broadcast %195 : vector<2x1xf32> to vector<2x32xf32>
    %198 = vector.broadcast %196 : vector<1x32xf32> to vector<2x32xf32>
    %199 = arith.mulf %197, %198 : vector<2x32xf32>
    %200 = arith.addf %194, %199 : vector<2x32xf32>
    %201 = vector.extract_strided_slice %1 {offsets = [0, 14], sizes = [2, 1], strides = [1, 1]} : vector<2x26xf32> to vector<2x1xf32>
    %202 = vector.broadcast %201 : vector<2x1xf32> to vector<2x32xf32>
    %203 = arith.addf %200, %202 : vector<2x32xf32>
    %cst_17 = arith.constant 0.000000e+00 : f32
    %204 = vector.broadcast %cst_17 : f32 to vector<2x32xf32>
    %205 = arith.maximumf %203, %204 : vector<2x32xf32>
    %206 = arith.maximumf %165, %205 : vector<2x32xf32>
    %207 = arith.mulf %206, %206 : vector<2x32xf32>
    %208 = tpu.concatenate %206, %207 in 0 : vector<2x32xf32>, vector<2x32xf32> -> vector<4x32xf32>
    %cst_18 = arith.constant dense<0.000000e+00> : vector<4xf32>
    %209 = vector.multi_reduction <add>, %208, %cst_18 [1] : vector<4x32xf32> to vector<4xf32>
    %210 = vector.shape_cast %209 : vector<4xf32> to vector<4x1xf32>
    %211 = vector.extract_strided_slice %210 {offsets = [0, 0], sizes = [2, 1], strides = [1, 1]} : vector<4x1xf32> to vector<2x1xf32>
    %cst_19 = arith.constant 3.200000e+01 : f32
    %212 = vector.broadcast %cst_19 : f32 to vector<2x1xf32>
    %213 = arith.divf %211, %212 : vector<2x1xf32>
    %214 = vector.extract_strided_slice %210 {offsets = [2, 0], sizes = [2, 1], strides = [1, 1]} : vector<4x1xf32> to vector<2x1xf32>
    %cst_20 = arith.constant 3.200000e+01 : f32
    %215 = vector.broadcast %cst_20 : f32 to vector<2x1xf32>
    %216 = arith.divf %214, %215 : vector<2x1xf32>
    %217 = arith.mulf %213, %213 : vector<2x1xf32>
    %218 = arith.subf %216, %217 : vector<2x1xf32>
    %cst_21 = arith.constant 0.000000e+00 : f32
    %219 = vector.broadcast %cst_21 : f32 to vector<2x1xf32>
    %220 = arith.maximumf %218, %219 : vector<2x1xf32>
    %cst_22 = arith.constant 9.99999974E-6 : f32
    %221 = vector.broadcast %cst_22 : f32 to vector<2x1xf32>
    %222 = arith.addf %220, %221 : vector<2x1xf32>
    %223 = math.rsqrt %222 : vector<2x1xf32>
    %224 = vector.extract_strided_slice %1 {offsets = [0, 24], sizes = [2, 1], strides = [1, 1]} : vector<2x26xf32> to vector<2x1xf32>
    %225 = arith.mulf %223, %224 : vector<2x1xf32>
    %226 = vector.extract_strided_slice %1 {offsets = [0, 25], sizes = [2, 1], strides = [1, 1]} : vector<2x26xf32> to vector<2x1xf32>
    %227 = arith.mulf %213, %225 : vector<2x1xf32>
    %228 = arith.subf %226, %227 : vector<2x1xf32>
    %229 = vector.broadcast %225 : vector<2x1xf32> to vector<2x32xf32>
    %230 = arith.mulf %206, %229 : vector<2x32xf32>
    %231 = vector.broadcast %228 : vector<2x1xf32> to vector<2x32xf32>
    %232 = arith.addf %230, %231 : vector<2x32xf32>
    %233 = vector.extract_strided_slice %1 {offsets = [0, 17], sizes = [2, 1], strides = [1, 1]} : vector<2x26xf32> to vector<2x1xf32>
    %234 = vector.extract_strided_slice %232 {offsets = [0, 0], sizes = [1, 24], strides = [1, 1]} : vector<2x32xf32> to vector<1x24xf32>
    %235 = vector.broadcast %233 : vector<2x1xf32> to vector<2x24xf32>
    %236 = vector.broadcast %234 : vector<1x24xf32> to vector<2x24xf32>
    %237 = arith.mulf %235, %236 : vector<2x24xf32>
    %238 = vector.extract_strided_slice %1 {offsets = [0, 18], sizes = [2, 1], strides = [1, 1]} : vector<2x26xf32> to vector<2x1xf32>
    %239 = vector.extract_strided_slice %232 {offsets = [0, 4], sizes = [1, 24], strides = [1, 1]} : vector<2x32xf32> to vector<1x24xf32>
    %240 = vector.broadcast %238 : vector<2x1xf32> to vector<2x24xf32>
    %241 = vector.broadcast %239 : vector<1x24xf32> to vector<2x24xf32>
    %242 = arith.mulf %240, %241 : vector<2x24xf32>
    %243 = arith.addf %237, %242 : vector<2x24xf32>
    %244 = vector.extract_strided_slice %1 {offsets = [0, 19], sizes = [2, 1], strides = [1, 1]} : vector<2x26xf32> to vector<2x1xf32>
    %245 = vector.extract_strided_slice %232 {offsets = [0, 8], sizes = [1, 24], strides = [1, 1]} : vector<2x32xf32> to vector<1x24xf32>
    %246 = vector.broadcast %244 : vector<2x1xf32> to vector<2x24xf32>
    %247 = vector.broadcast %245 : vector<1x24xf32> to vector<2x24xf32>
    %248 = arith.mulf %246, %247 : vector<2x24xf32>
    %249 = arith.addf %243, %248 : vector<2x24xf32>
    %250 = vector.extract_strided_slice %1 {offsets = [0, 20], sizes = [2, 1], strides = [1, 1]} : vector<2x26xf32> to vector<2x1xf32>
    %251 = vector.extract_strided_slice %232 {offsets = [1, 0], sizes = [1, 24], strides = [1, 1]} : vector<2x32xf32> to vector<1x24xf32>
    %252 = vector.broadcast %250 : vector<2x1xf32> to vector<2x24xf32>
    %253 = vector.broadcast %251 : vector<1x24xf32> to vector<2x24xf32>
    %254 = arith.mulf %252, %253 : vector<2x24xf32>
    %255 = arith.addf %249, %254 : vector<2x24xf32>
    %256 = vector.extract_strided_slice %1 {offsets = [0, 21], sizes = [2, 1], strides = [1, 1]} : vector<2x26xf32> to vector<2x1xf32>
    %257 = vector.extract_strided_slice %232 {offsets = [1, 4], sizes = [1, 24], strides = [1, 1]} : vector<2x32xf32> to vector<1x24xf32>
    %258 = vector.broadcast %256 : vector<2x1xf32> to vector<2x24xf32>
    %259 = vector.broadcast %257 : vector<1x24xf32> to vector<2x24xf32>
    %260 = arith.mulf %258, %259 : vector<2x24xf32>
    %261 = arith.addf %255, %260 : vector<2x24xf32>
    %262 = vector.extract_strided_slice %1 {offsets = [0, 22], sizes = [2, 1], strides = [1, 1]} : vector<2x26xf32> to vector<2x1xf32>
    %263 = vector.extract_strided_slice %232 {offsets = [1, 8], sizes = [1, 24], strides = [1, 1]} : vector<2x32xf32> to vector<1x24xf32>
    %264 = vector.broadcast %262 : vector<2x1xf32> to vector<2x24xf32>
    %265 = vector.broadcast %263 : vector<1x24xf32> to vector<2x24xf32>
    %266 = arith.mulf %264, %265 : vector<2x24xf32>
    %267 = arith.addf %261, %266 : vector<2x24xf32>
    %268 = vector.extract_strided_slice %1 {offsets = [0, 23], sizes = [2, 1], strides = [1, 1]} : vector<2x26xf32> to vector<2x1xf32>
    %269 = vector.broadcast %268 : vector<2x1xf32> to vector<2x24xf32>
    %270 = arith.addf %267, %269 : vector<2x24xf32>
    %cst_23 = arith.constant 0.000000e+00 : f32
    %271 = vector.broadcast %cst_23 : f32 to vector<2x24xf32>
    %272 = arith.maximumf %270, %271 : vector<2x24xf32>
    %273 = vector.extract_strided_slice %272 {offsets = [0, 0], sizes = [2, 4], strides = [1, 1]} : vector<2x24xf32> to vector<2x4xf32>
    %274 = vector.extract_strided_slice %272 {offsets = [0, 4], sizes = [2, 4], strides = [1, 1]} : vector<2x24xf32> to vector<2x4xf32>
    %275 = arith.maximumf %273, %274 : vector<2x4xf32>
    %276 = vector.extract_strided_slice %272 {offsets = [0, 8], sizes = [2, 4], strides = [1, 1]} : vector<2x24xf32> to vector<2x4xf32>
    %277 = vector.extract_strided_slice %272 {offsets = [0, 12], sizes = [2, 4], strides = [1, 1]} : vector<2x24xf32> to vector<2x4xf32>
    %278 = arith.maximumf %276, %277 : vector<2x4xf32>
    %279 = arith.addf %275, %278 : vector<2x4xf32>
    %280 = vector.extract_strided_slice %272 {offsets = [0, 16], sizes = [2, 4], strides = [1, 1]} : vector<2x24xf32> to vector<2x4xf32>
    %281 = vector.extract_strided_slice %272 {offsets = [0, 20], sizes = [2, 4], strides = [1, 1]} : vector<2x24xf32> to vector<2x4xf32>
    %282 = arith.maximumf %280, %281 : vector<2x4xf32>
    %283 = arith.addf %279, %282 : vector<2x4xf32>
    %cst_24 = arith.constant 0.333333343 : f32
    %284 = vector.broadcast %cst_24 : f32 to vector<2x4xf32>
    %285 = arith.mulf %283, %284 : vector<2x4xf32>
    %c0_25 = arith.constant 0 : index
    %c0_26 = arith.constant 0 : index
    %286 = vector.load %arg2[%c0_25, %c0_26] : memref<2x4xf32, #tpu.memory_space<vmem>>, vector<2x4xf32>
    tpu.vector_store %arg2[%c0_25, %c0_26], %285 {strides = array<i32>} : memref<2x4xf32, #tpu.memory_space<vmem>>, vector<2x4xf32>,
    return
  }
}

</mosaic_0001>

<bundles_post_ra>
// kernel: gender_classify_forward.1
= control target key start
LH: loop header
LB: loop body
LE: loop exit
PB: predicated region body
PF: predicated region fallthrough
CT: control target
= control target key end

     0   :  { %vm17_vm0 = vcmask 523264   ;;  %vm20_vm1 = vcmask 1041408   ;;  %vm23_vm2 = vcmask 517120   ;;  %s815_s0 = inlined_call_operand.vmem [shape: f32[10,192], index: 0, kind: input, shape index: {}]   ;;  %s816_s1 = inlined_call_operand.vmem [shape: f32[2,26], index: 1, kind: input, shape index: {}]   ;;  %s817_s2 = inlined_call_operand.hbm [shape: f32[2,4], index: 2, kind: output, shape index: {}]  }
   0x1   :  { %v697_v0 = vld [vmem:[%s815_s0] sm:$0xff]  ;;  %v702_v1 = vld [vmem:[%s815_s0 + $0x8] sm:$0xff]  ;;  %v707_v2 = vld [vmem:[%s815_s0 + $0x10] sm:$0x3] }
   0x2   :  { %v712_v3 = vld [vmem:[%s815_s0 + $0x18] sm:$0x3]  ;;  %v18_v4 = vsel %vm17_vm0, %v702_v1, 0.0  ;;  %v21_v5 = vsel %vm20_vm1, %v707_v2, 0.0  ;;  %v35_v6 = vmul.f32 %v697_v0, %v697_v0  ;;  %v36_v8 = vmul.f32 %v702_v1, %v702_v1 }
   0x3   :  { %v19_v7 = vadd.f32 %v18_v4, %v697_v0  ;;  %v37_v9 = vmul.f32 %v707_v2, %v707_v2 }
   0x4   :  { %7 = vsyncpa [#allocation3], 0  ;;  %v24_v10 = vsel %vm23_vm2, %v712_v3, 0.0  ;;  %v38_v11 = vmul.f32 %v712_v3, %v712_v3  ;;  %v39_v13 = vsel %vm17_vm0, %v36_v8, 0.0  ;;  %v731_v20 = vld [vmem:[%s816_s1] sm:$0x3]  ;;  %v97_v59 = vlaneseq }
   0x5   :  { %v22_v12 = vadd.f32 %v21_v5, %v19_v7  ;;  %v41_v14 = vsel %vm20_vm1, %v37_v9, 0.0  ;;  %v40_v15 = vadd.f32 %v39_v13, %v35_v6  ;;  %vm82_vm3 = vcmask 33792   ;;  %s643_s23 = smov 0.0   ;;  %s645_s27 = smov 1  }
   0x6   :  { %v43_v17 = vsel %vm23_vm2, %v38_v11, 0.0  ;;  %v83_v21 = vsel %vm82_vm3, %v731_v20, 0.0  ;;  %v642_v35 = vmov 6   ;;  %v644_v40 = vmov 0   ;;  %s646_s28 = smov 126   ;;  %s652_s29 = smov 113  }
   0x7   :  { %v25_v16 = vadd.f32 %v24_v10, %v22_v12  ;;  %v42_v18 = vadd.f32 %v41_v14, %v40_v15  ;;  %84 = vadd.xlane.f32.xlu1 %v83_v21  ;;  %588 = vset.pattern.permute.xlu0 %v642_v35  ;;  %v647_v50 = vmov 1   ;;  %v648_v51 = vmov 2   ;;  %s655_s30 = smov 16   ;;  %s662_s3 = smov 96  }
   0x8   :  { %589 = vset.pattern.permute.xlu1 %v644_v40  ;;  %v649_v52 = vmov 3   ;;  %v650_v53 = vmov 4   ;;  %v651_v54 = vmov 5   ;;  %v272_v57 = vrot.slane %v731_v20, 6  ;;  %s663_s4 = smov 64   ;;  %s664_s5 = smov 32  }
   0x9   :  { %26 = vadd.xlane.f32.xlu0 %v25_v16  ;;  %v44_v19 = vadd.f32 %v43_v17, %v42_v18  ;;  %v98_v61 = vshrl.u32 %v97_v59, 7  ;;  %vm254_vm4 = vcmask 1043456   ;;  %vm256_vm5 = vcmask 519168   ;;  %s665_s6 = smov 104   ;;  %s668_s7 = smov 25  }
   0xa   :  { %vm410_vm6 = vcmask 257024   ;;  %s675_s8 = smov 124   ;;  %s676_s9 = smov 120   ;;  %vm529_vm7 = vcmask 25600  }
   0xb   :  { %v743_v62 = vsub.s32 0, %v98_v61  ;;  %v745_v63 = vsub.s32 1, %v98_v61  ;;  %v192_v4 = vsub.s32 6, %v98_v61  ;;  %v182_v6 = vsub.s32 5, %v98_v61  ;;  %s677_s10 = smov 112   ;;  %s678_s11 = smov [#allocation2]  }
   0xc   :  { %v129_v7 = vsub.s32 2, %v98_v61  ;;  %v204_v8 = vsub.s32 7, %v98_v61  ;;  %v145_v10 = vsub.s32 3, %v98_v61  ;;  %s537_s12 = sshll.u32 %s678_s11, 4  ;;  %s538_s12 = int_to_ptr.vmem [resolvable:$true] %s537_s12 }
   0xd   :  { %45 = vadd.xlane.f32.xlu0 %v44_v19  ;;  %v100_v9 = vrot.slane %v697_v0, %v743_v62  ;;  %v114_v11 = vrot.slane %v697_v0, %v745_v63  ;;  %v118_v12 = vrot.slane %v702_v1, %v745_v63  ;;  %v193_v13 = vrot.slane %v697_v0, %v192_v4  ;;  %s620_s13 = scalar_lea.vmem %s538_s12, 32  ;;  %p625_p1 = scmp.lt.s32.totalorder %s538_s12, %s538_s12 }
   0xe   :  { %v197_v14 = vrot.slane %v702_v1, %v192_v4  ;;  %v104_v15 = vrot.slane %v702_v1, %v743_v62  ;;  %v183_v16 = vrot.slane %v697_v0, %v182_v6  ;;  %v187_v17 = vrot.slane %v702_v1, %v182_v6  ;;  %p621_p0 = scmp.ne.s32.totalorder %s538_s12, %s620_s13  ;;  %p626_p2 = scmp.lt.s32.totalorder %s620_s13, %s620_s13 }
   0xf   :  { %v130_v18 = vrot.slane %v697_v0, %v129_v7  ;;  %v134_v19 = vrot.slane %v702_v1, %v129_v7  ;;  %v205_v21 = vrot.slane %v697_v0, %v204_v8 }
  0x10   :  { %p627_p3 = por %p626_p2, %p625_p1 }
  0x12   :  { %p628_p4 = pnand %p627_p3, %p621_p0 }
  0x90   :  { %v85_v44 = vpop.xlane.xlu1 %84 }
  0x92   :  { %v27_v22 = vpop.xlane.xlu0 %26 }
  0x93   :  { %v28_v23 = vrot.slane %v27_v22, 4 }
  0x95   :  { %v29_v24 = vadd.f32 %v28_v23, %v27_v22  ;;  %v209_v22 = vrot.slane %v702_v1, %v204_v8  ;;  %v217_v23 = vrot.slane %v707_v2, %v743_v62 }
  0x96   :  { %v46_v25 = vpop.xlane.xlu0 %45 }
  0x97   :  { %v30_v26 = vrot.slane %v29_v24, 2  ;;  %v47_v27 = vrot.slane %v46_v25, 4 }
  0x99   :  { %v48_v28 = vadd.f32 %v47_v27, %v46_v25  ;;  %v31_v29 = vadd.f32 %v30_v26, %v29_v24  ;;  %v146_v25 = vrot.slane %v697_v0, %v145_v10  ;;  %v150_v26 = vrot.slane %v702_v1, %v145_v10 }
  0x9a   :  { %v221_v27 = vrot.slane %v712_v3, %v743_v62 }
  0x9b   :  { %v49_v30 = vrot.slane %v48_v28, 2  ;;  %v32_v31 = vrot.slane %v31_v29, 1 }
  0x9d   :  { %v33_v32 = vadd.f32 %v32_v31, %v31_v29  ;;  %v50_v33 = vadd.f32 %v49_v30, %v48_v28  ;;  %v161_v28 = vsub.s32 4, %v98_v61 }
  0x9f   :  { %545 = vpush %v33_v32  ;;  %v51_v34 = vrot.slane %v50_v33, 1 }
  0xa1   :  { %v52_v36 = vadd.f32 %v51_v34, %v50_v33 }
  0xa3   :  { %547 = vpush %v52_v36 }
  0xd0   :  { %s546_s1 = spop %545 }
  0xd1   :  { %s56_s18 = smul.f32 0.00052083336, %s546_s1 }
  0xd3   :  { %s60_s19 = smul.f32 %s56_s18, %s56_s18  ;;  %v69_v42 = vstv %s56_s18 }
  0xd4   :  { %s548_s20 = spop %547 }
  0xd5   :  { %s59_s21 = smul.f32 0.00052083336, %s548_s20 }
  0xd7   :  { %s61_s22 = ssub.f32 %s59_s21, %s60_s19 }
  0xd9   :  { %s62_s24 = smax.f32 %s643_s23, %s61_s22 }
  0xda   :  { %s63_s25 = sadd.f32 1e-05, %s62_s24 }
  0xdc   :  { %v64_v37 = vstv %s63_s25 }
  0xdd   :  { %614 = vrsqrt.f32 %v64_v37 }
  0xea   :  { %v615_v38 = vpop.eup %614 }
  0xeb   :  { %549 = vpush %v615_v38 }
 0x11c   :  { %s550_s26 = spop %549 }
 0x11d   :  { %v67_v39 = vstv %s550_s26 }
 0x11e   :  { %v68_v41 = vmul.f32 %v67_v39, %v731_v20 }
 0x120   :  { %v70_v43 = vmul.f32 %v69_v42, %v68_v41  ;;  %78 = vperm.xlu0 %588, %v68_v41   ;;  %v162_v42 = vrot.slane %v697_v0, %v161_v28 }
 0x122   :  { %72 = vrot.lane.b32.xlu1 %v70_v43, %s645_s27  ;;  %v166_v43 = vrot.slane %v702_v1, %v161_v28 }
 0x124   :  { %595 = vset.pattern.permute.xlu0 %v644_v40 }
 0x125   :  { %273 = vrot.lane.b32.xlu0 %v272_v57, %s652_s29 }
 0x194   :  { %v73_v45 = vpop.permute.xlu1 %72 }
 0x195   :  { %v75_v46 = vsub.f32 %v731_v20, %v73_v45  ;;  %v233_v45 = vrot.slane %v712_v3, %v745_v63 }
 0x197   :  { %v86_v47 = vmul.f32 %v85_v44, %v75_v46  ;;  %v229_v44 = vrot.slane %v707_v2, %v745_v63 }
 0x199   :  { %88 = vrot.lane.b32.xlu1 %v86_v47, %s646_s28 }
 0x19b   :  { %v79_v48 = vpop.permute.xlu0 %78 }
 0x19c   :  { %v81_v49 = vmul.f32 %v79_v48, %v731_v20 }
 0x19e   :  { %94 = vperm.xlu1 %589, %v81_v49  }
 0x1a2   :  { %590 = vset.pattern.permute.xlu1 %v647_v50 }
 0x1a3   :  { %108 = vperm.xlu1 %590, %v81_v49  }
 0x1a7   :  { %591 = vset.pattern.permute.xlu1 %v648_v51 }
 0x1a8   :  { %124 = vperm.xlu1 %591, %v81_v49  }
 0x1ac   :  { %592 = vset.pattern.permute.xlu1 %v649_v52 }
 0x1ad   :  { %140 = vperm.xlu1 %592, %v81_v49  }
 0x1b1   :  { %593 = vset.pattern.permute.xlu1 %v650_v53 }
 0x1b2   :  { %156 = vperm.xlu1 %593, %v81_v49  }
 0x1b6   :  { %594 = vset.pattern.permute.xlu1 %v651_v54 }
 0x20b   :  { %v89_v55 = vpop.permute.xlu1 %88 }
 0x20c   :  { %v91_v56 = vadd.f32 %v89_v55, %v731_v20 }
 0x20e   :  { %173 = vperm.xlu1 %594, %v91_v56  }
 0x219   :  { %v95_v58 = vpop.permute.xlu1 %94 }
 0x21a   :  { %v105_v33 = vmul.f32 %v100_v9, %v95_v58  ;;  %v106_v34 = vmul.f32 %v104_v15, %v95_v58  ;;  %v188_v35 = vmul.f32 %v183_v16, %v95_v58  ;;  %v189_v36 = vmul.f32 %v187_v17, %v95_v58 }
 0x21e   :  { %v109_v60 = vpop.permute.xlu1 %108 }
 0x21f   :  { %v119_v29 = vmul.f32 %v114_v11, %v109_v60  ;;  %v120_v30 = vmul.f32 %v118_v12, %v109_v60  ;;  %v198_v31 = vmul.f32 %v193_v13, %v109_v60  ;;  %v199_v32 = vmul.f32 %v197_v14, %v109_v60 }
 0x221   :  { %v121_v46 = vadd.f32 %v119_v29, %v105_v33  ;;  %v122_v47 = vadd.f32 %v120_v30, %v106_v34  ;;  %v200_v48 = vadd.f32 %v198_v31, %v188_v35  ;;  %v201_v49 = vadd.f32 %v199_v32, %v189_v36 }
 0x223   :  { %v125_v5 = vpop.permute.xlu1 %124 }
 0x224   :  { %v135_v37 = vmul.f32 %v130_v18, %v125_v5  ;;  %v136_v38 = vmul.f32 %v134_v19, %v125_v5  ;;  %v210_v39 = vmul.f32 %v205_v21, %v125_v5  ;;  %v211_v41 = vmul.f32 %v209_v22, %v125_v5 }
 0x226   :  { %v137_v55 = vadd.f32 %v135_v37, %v121_v46  ;;  %v138_v56 = vadd.f32 %v136_v38, %v122_v47  ;;  %v212_v0 = vadd.f32 %v210_v39, %v200_v48  ;;  %v213_v58 = vadd.f32 %v211_v41, %v201_v49  ;;  %v274_v39 = vpop.permute.xlu0 %273 }
 0x227   :  { %v653_v38 = vmov 12   ;;  %v654_v41 = vmov 11   ;;  %v656_v46 = vmov 9   ;;  %v657_v47 = vmov 16  }
 0x228   :  { %v141_v24 = vpop.permute.xlu1 %140  ;;  %599 = vset.pattern.permute.xlu1 %v653_v38 }
 0x229   :  { %v151_v51 = vmul.f32 %v146_v25, %v141_v24  ;;  %v152_v52 = vmul.f32 %v150_v26, %v141_v24  ;;  %v222_v53 = vmul.f32 %v217_v23, %v141_v24  ;;  %v223_v54 = vmul.f32 %v221_v27, %v141_v24 }
 0x22b   :  { %v153_v61 = vadd.f32 %v151_v51, %v137_v55  ;;  %v154_v4 = vadd.f32 %v152_v52, %v138_v56  ;;  %v224_v3 = vadd.f32 %v222_v53, %v212_v0  ;;  %v225_v5 = vadd.f32 %v223_v54, %v213_v58 }
 0x22c   :  { %v659_v51 = vmov 14   ;;  %v660_v52 = vmov 13   ;;  %v661_v53 = vmov 8  }
 0x22d   :  { %v157_v50 = vpop.permute.xlu1 %156 }
 0x22e   :  { %v167_v1 = vmul.f32 %v162_v42, %v157_v50  ;;  %v168_v59 = vmul.f32 %v166_v43, %v157_v50  ;;  %v234_v60 = vmul.f32 %v229_v44, %v157_v50  ;;  %v235_v2 = vmul.f32 %v233_v45, %v157_v50 }
 0x22f   :  { %v658_v50 = vmov 10  }
 0x230   :  { %v169_v6 = vadd.f32 %v167_v1, %v153_v61  ;;  %v170_v7 = vadd.f32 %v168_v59, %v154_v4  ;;  %v236_v8 = vadd.f32 %v234_v60, %v224_v3  ;;  %v237_v9 = vadd.f32 %v235_v2, %v225_v5 }
 0x289   :  { %v174_v10 = vpop.permute.xlu1 %173 }
 0x28a   :  { %v176_v11 = vadd.f32 %v174_v10, %v169_v6  ;;  %v177_v12 = vadd.f32 %v174_v10, %v170_v7  ;;  %v238_v13 = vadd.f32 %v236_v8, %v174_v10  ;;  %v239_v14 = vadd.f32 %v237_v9, %v174_v10 }
 0x28c   :  { %v178_v15 = vmax.f32 %v176_v11, 0.0  ;;  %v179_v16 = vmax.f32 %v177_v12, 0.0  ;;  %v240_v17 = vmax.f32 %v238_v13, 0.0  ;;  %v241_v18 = vmax.f32 %v239_v14, 0.0 }
 0x28e   :  { %v775_v19 = vmax.f32 %v178_v15, %v240_v17  ;;  %v243_v21 = vmax.f32 %v179_v16, %v241_v18 }
 0x290   :  { %v244_v22 = vmul.f32 %v775_v19, %v775_v19  ;;  %v245_v23 = vmul.f32 %v243_v21, %v243_v21 }
 0x292   :  { %v248_v24 = vrot.slane %v244_v22, 6  ;;  %v249_v25 = vrot.slane %v245_v23, 6 }
 0x294   :  { %v252_v26 = vsel %vm20_vm1, %v775_v19, %v248_v24  ;;  %v253_v27 = vsel %vm20_vm1, %v243_v21, %v249_v25 }
 0x295   :  { %v255_v28 = vsel %vm254_vm4, %v252_v26, 0.0  ;;  %v257_v29 = vsel %vm256_vm5, %v253_v27, 0.0 }
 0x296   :  { %v258_v30 = vadd.f32 %v257_v29, %v255_v28 }
 0x298   :  { %259 = vadd.xlane.f32.xlu1 %v258_v30 }
 0x2a9   :  { %340 = vperm.xlu1 %599, %v731_v20  }
 0x2ad   :  { %602 = vset.pattern.permute.xlu1 %v654_v41 }
 0x2ae   :  { %330 = vperm.xlu1 %602, %v731_v20  }
 0x2b2   :  { %603 = vset.pattern.permute.xlu1 %v659_v51 }
 0x321   :  { %v260_v31 = vpop.xlane.xlu1 %259 }
 0x322   :  { %v262_v32 = vmul.f32 0.0052083335, %v260_v31 }
 0x324   :  { %v263_v33 = vmul.f32 %v262_v32, %v262_v32 }
 0x326   :  { %v265_v34 = vrot.slane %v263_v33, 6 }
 0x328   :  { %v267_v35 = vsub.f32 %v262_v32, %v265_v34 }
 0x32a   :  { %v268_v36 = vmax.f32 %v267_v35, 0.0 }
 0x32c   :  { %v269_v37 = vadd.f32 1e-05, %v268_v36 }
 0x32e   :  { %616 = vrsqrt.f32 %v269_v37 }
 0x33b   :  { %v617_v42 = vpop.eup %616 }
 0x33c   :  { %v276_v43 = vmul.f32 %v617_v42, %v274_v39 }
 0x33e   :  { %v278_v44 = vrot.slane %v276_v43, 2 }
 0x340   :  { %v280_v45 = vmul.f32 %v278_v44, %v262_v32 }
 0x342   :  { %282 = vrot.lane.b32.xlu0 %v280_v45, %s655_s30 }
 0x346   :  { %287 = vperm.xlu0 %595, %v276_v43  }
 0x34a   :  { %596 = vset.pattern.permute.xlu0 %v656_v46 }
 0x34b   :  { %310 = vperm.xlu0 %596, %v731_v20  }
 0x34f   :  { %597 = vset.pattern.permute.xlu0 %v657_v47 }
 0x3b4   :  { %v283_v48 = vpop.permute.xlu0 %282 }
 0x3b5   :  { %v285_v49 = vsub.f32 %v731_v20, %v283_v48 }
 0x3b7   :  { %295 = vperm.xlu0 %597, %v285_v49  }
 0x3bb   :  { %598 = vset.pattern.permute.xlu0 %v658_v50 }
 0x3bc   :  { %320 = vperm.xlu0 %598, %v731_v20  }
 0x3c0   :  { %600 = vset.pattern.permute.xlu0 %v660_v52 }
 0x3c1   :  { %350 = vperm.xlu0 %600, %v731_v20   ;;  %v288_v54 = vpop.permute.xlu0 %287 }
 0x3c2   :  { %v289_v56 = vrot.slane %v288_v54, 2 }
 0x3c4   :  { %v292_v0 = vmul.f32 %v289_v56, %v243_v21  ;;  %v291_v60 = vmul.f32 %v289_v56, %v775_v19 }
 0x3c5   :  { %601 = vset.pattern.permute.xlu0 %v661_v53 }
 0x3c6   :  { %301 = vperm.xlu0 %601, %v731_v20   ;;  %v311_v55 = vpop.permute.xlu0 %310 }
 0x3ca   :  { %604 = vset.pattern.permute.xlu0 %v644_v40  ;;  %v341_v40 = vpop.permute.xlu1 %340 }
 0x3ce   :  { %v331_v15 = vpop.permute.xlu1 %330 }
 0x432   :  { %v296_v58 = vpop.permute.xlu0 %295 }
 0x433   :  { %v299_v1 = vadd.f32 %v296_v58, %v292_v0  ;;  %v298_v4 = vadd.f32 %v296_v58, %v291_v60 }
 0x435   :  { %v368_v59 = vrot.slane %v299_v1, %v743_v62  ;;  %v385_v3 = vrot.slane %v299_v1, %v745_v63  ;;  %v307_v6 = vrot.slane %v298_v4, %v743_v62  ;;  %v336_v10 = vrot.slane %v298_v4, %v745_v63 }
 0x436   :  { %v667_v1 = vmov 20   ;;  %v670_v4 = vmov 25  }
 0x437   :  { %v321_v2 = vpop.permute.xlu0 %320  ;;  %v369_v61 = vmul.f32 %v368_v59, %v311_v55  ;;  %v386_v7 = vmul.f32 %v385_v3, %v341_v40  ;;  %v313_v11 = vmul.f32 %v311_v55, %v307_v6  ;;  %v343_v13 = vmul.f32 %v341_v40, %v336_v10 }
 0x438   :  { %v375_v5 = vmul.f32 %v368_v59, %v321_v2  ;;  %v323_v12 = vmul.f32 %v321_v2, %v307_v6  ;;  %v337_v22 = vmul.f32 %v336_v10, %v331_v15  ;;  %v671_v40 = vmov 19  }
 0x439   :  { %371 = vrot.lane.b32.xlu1 %v369_v61, %s662_s3  ;;  %v669_v61 = vmov 18  }
 0x43a   :  { %377 = vrot.lane.b32.xlu0 %v375_v5, %s663_s4 }
 0x43c   :  { %v351_v8 = vpop.permute.xlu0 %350 }
 0x43d   :  { %360 = vperm.xlu1 %603, %v731_v20   ;;  %v392_v9 = vmul.f32 %v385_v3, %v351_v8  ;;  %v353_v14 = vmul.f32 %v351_v8, %v336_v10  ;;  %v674_v8 = vmov 17  }
 0x43e   :  { %388 = vrot.lane.b32.xlu0 %v386_v7, %s662_s3  ;;  %v673_v7 = vmov 22  }
 0x441   :  { %394 = vrot.lane.b32.xlu1 %v392_v9, %s663_s4  ;;  %v302_v16 = vpop.permute.xlu0 %301 }
 0x442   :  { %315 = vrot.lane.b32.xlu0 %v313_v11, %s662_s3  ;;  %v308_v17 = vmul.f32 %v307_v6, %v302_v16  ;;  %v672_v6 = vmov 23  }
 0x445   :  { %325 = vrot.lane.b32.xlu1 %v323_v12, %s663_s4 }
 0x446   :  { %345 = vrot.lane.b32.xlu0 %v343_v13, %s662_s3 }
 0x449   :  { %355 = vrot.lane.b32.xlu1 %v353_v14, %s663_s4 }
 0x4ab   :  { %v372_v18 = vpop.permute.xlu1 %371 }
 0x4ac   :  { %v374_v19 = vadd.f32 %v372_v18, %v308_v17  ;;  %v378_v21 = vpop.permute.xlu0 %377 }
 0x4ae   :  { %v380_v23 = vadd.f32 %v378_v21, %v374_v19 }
 0x4b0   :  { %v381_v24 = vadd.f32 %v380_v23, %v337_v22  ;;  %v389_v25 = vpop.permute.xlu0 %388 }
 0x4b2   :  { %v391_v27 = vadd.f32 %v389_v25, %v381_v24 }
 0x4b4   :  { %v316_v28 = vpop.permute.xlu0 %315 }
 0x4b5   :  { %v318_v31 = vadd.f32 %v316_v28, %v308_v17 }
 0x4b8   :  { %v361_v26 = vpop.permute.xlu1 %360  ;;  %v346_v37 = vpop.permute.xlu0 %345 }
 0x4bc   :  { %v395_v29 = vpop.permute.xlu1 %394 }
 0x4bd   :  { %v397_v30 = vadd.f32 %v395_v29, %v391_v27 }
 0x4bf   :  { %v398_v32 = vadd.f32 %v397_v30, %v361_v26 }
 0x4c0   :  { %v326_v33 = vpop.permute.xlu1 %325 }
 0x4c1   :  { %v399_v34 = vmax.f32 %v398_v32, 0.0  ;;  %v328_v35 = vadd.f32 %v326_v33, %v318_v31 }
 0x4c3   :  { %v338_v36 = vadd.f32 %v337_v22, %v328_v35  ;;  %401 = vrot.lane.b32.xlu0 %v399_v34, %s664_s5 }
 0x4c4   :  { %v356_v39 = vpop.permute.xlu1 %355 }
 0x4c5   :  { %v348_v38 = vadd.f32 %v346_v37, %v338_v36 }
 0x4c7   :  { %v358_v41 = vadd.f32 %v356_v39, %v348_v38  ;;  %424 = vrot.lane.b32.xlu0 %v272_v57, %s665_s6  ;;  %v666_v57 = vmov 21  }
 0x4c8   :  { %608 = vset.pattern.permute.xlu1 %v666_v57 }
 0x4c9   :  { %v363_v42 = vadd.f32 %v361_v26, %v358_v41 }
 0x4cb   :  { %v364_v43 = vmax.f32 %v363_v42, 0.0 }
 0x535   :  { %v402_v44 = vpop.permute.xlu0 %401 }
 0x536   :  { %v404_v45 = vmax.f32 %v364_v43, %v402_v44 }
 0x538   :  { %v405_v46 = vmul.f32 %v404_v45, %v404_v45 }
 0x539   :  { %v425_v0 = vpop.permute.xlu0 %424 }
 0x53a   :  { %v407_v47 = vrot.slane %v405_v46, 6 }
 0x53c   :  { %v409_v48 = vsel %vm20_vm1, %v404_v45, %v407_v47 }
 0x53d   :  { %v411_v49 = vsel %vm410_vm6, %v409_v48, 0.0 }
 0x53e   :  { %412 = vadd.xlane.f32.xlu1 %v411_v49 }
 0x54f   :  { %489 = vperm.xlu1 %608, %v731_v20  }
 0x553   :  { %611 = vset.pattern.permute.xlu1 %v667_v1 }
 0x554   :  { %479 = vperm.xlu1 %611, %v731_v20  }
 0x558   :  { %612 = vset.pattern.permute.xlu1 %v672_v6 }
 0x5c7   :  { %v413_v50 = vpop.xlane.xlu1 %412 }
 0x5c8   :  { %v415_v51 = vmul.f32 0.03125, %v413_v50 }
 0x5ca   :  { %v416_v52 = vmul.f32 %v415_v51, %v415_v51 }
 0x5cb   :  { %v490_v21 = vpop.permute.xlu1 %489 }
 0x5cc   :  { %v418_v53 = vrot.slane %v416_v52, 6 }
 0x5ce   :  { %v420_v54 = vsub.f32 %v415_v51, %v418_v53 }
 0x5d0   :  { %v421_v55 = vmax.f32 %v420_v54, 0.0 }
 0x5d2   :  { %v422_v56 = vadd.f32 1e-05, %v421_v55 }
 0x5d4   :  { %618 = vrsqrt.f32 %v422_v56 }
 0x5e1   :  { %v619_v58 = vpop.eup %618 }
 0x5e2   :  { %v427_v59 = vmul.f32 %v619_v58, %v425_v0 }
 0x5e4   :  { %v429_v60 = vrot.slane %v427_v59, 2 }
 0x5e6   :  { %v431_v2 = vmul.f32 %v429_v60, %v415_v51 }
 0x5e8   :  { %433 = vrot.lane.b32.xlu0 %v431_v2, %s668_s7 }
 0x5ec   :  { %438 = vperm.xlu0 %604, %v427_v59  }
 0x5f0   :  { %605 = vset.pattern.permute.xlu0 %v669_v61 }
 0x5f1   :  { %459 = vperm.xlu0 %605, %v731_v20  }
 0x5f5   :  { %606 = vset.pattern.permute.xlu0 %v670_v4 }
 0x65a   :  { %v434_v3 = vpop.permute.xlu0 %433 }
 0x65b   :  { %v436_v5 = vsub.f32 %v731_v20, %v434_v3 }
 0x65d   :  { %445 = vperm.xlu0 %606, %v436_v5  }
 0x661   :  { %607 = vset.pattern.permute.xlu0 %v671_v40 }
 0x662   :  { %469 = vperm.xlu0 %607, %v731_v20  }
 0x666   :  { %609 = vset.pattern.permute.xlu0 %v673_v7 }
 0x667   :  { %499 = vperm.xlu0 %609, %v731_v20   ;;  %v439_v9 = vpop.permute.xlu0 %438 }
 0x668   :  { %v440_v11 = vrot.slane %v439_v9, 2 }
 0x66a   :  { %v442_v12 = vmul.f32 %v440_v11, %v404_v45 }
 0x66b   :  { %610 = vset.pattern.permute.xlu0 %v674_v8 }
 0x66c   :  { %450 = vperm.xlu0 %610, %v731_v20   ;;  %v460_v10 = vpop.permute.xlu0 %459 }
 0x670   :  { %613 = vset.pattern.permute.xlu0 %v672_v6 }
 0x6d8   :  { %v446_v13 = vpop.permute.xlu0 %445 }
 0x6d9   :  { %v448_v14 = vadd.f32 %v446_v13, %v442_v12 }
 0x6db   :  { %v456_v15 = vrot.slane %v448_v14, %v743_v62  ;;  %v485_v18 = vrot.slane %v448_v14, %v745_v63  ;;  %v480_v62 = vpop.permute.xlu1 %479 }
 0x6dd   :  { %v470_v16 = vpop.permute.xlu0 %469  ;;  %v462_v17 = vmul.f32 %v460_v10, %v456_v15  ;;  %v492_v22 = vmul.f32 %v490_v21, %v485_v18  ;;  %v486_v29 = vmul.f32 %v485_v18, %v480_v62 }
 0x6de   :  { %v472_v19 = vmul.f32 %v470_v16, %v456_v15 }
 0x6df   :  { %464 = vrot.lane.b32.xlu1 %v462_v17, %s675_s8 }
 0x6e0   :  { %474 = vrot.lane.b32.xlu0 %v472_v19, %s676_s9 }
 0x6e2   :  { %v500_v23 = vpop.permute.xlu0 %499 }
 0x6e3   :  { %509 = vperm.xlu1 %612, %v731_v20   ;;  %v502_v24 = vmul.f32 %v500_v23, %v485_v18 }
 0x6e4   :  { %494 = vrot.lane.b32.xlu0 %v492_v22, %s675_s8 }
 0x6e7   :  { %504 = vrot.lane.b32.xlu1 %v502_v24, %s676_s9  ;;  %v451_v25 = vpop.permute.xlu0 %450 }
 0x6e8   :  { %v457_v26 = vmul.f32 %v456_v15, %v451_v25 }
 0x751   :  { %v465_v27 = vpop.permute.xlu1 %464 }
 0x752   :  { %v467_v63 = vadd.f32 %v465_v27, %v457_v26  ;;  %v475_v28 = vpop.permute.xlu0 %474 }
 0x754   :  { %v477_v30 = vadd.f32 %v475_v28, %v467_v63 }
 0x756   :  { %v487_v31 = vadd.f32 %v486_v29, %v477_v30  ;;  %v495_v32 = vpop.permute.xlu0 %494 }
 0x758   :  { %v497_v34 = vadd.f32 %v495_v32, %v487_v31 }
 0x75e   :  { %v510_v33 = vpop.permute.xlu1 %509 }
 0x762   :  { %v505_v35 = vpop.permute.xlu1 %504 }
 0x763   :  { %v507_v36 = vadd.f32 %v505_v35, %v497_v34 }
 0x765   :  { %v512_v37 = vadd.f32 %v510_v33, %v507_v36 }
 0x767   :  { %v513_v20 = vmax.f32 %v512_v37, 0.0 }
 0x769   :  { %515 = vrot.lane.b32.xlu0 %v513_v20, %s675_s8 }
 0x7db   :  { %v516_v38 = vpop.permute.xlu0 %515 }
 0x7dc   :  { %v518_v39 = vmax.f32 %v513_v20, %v516_v38 }
 0x7de   :  { %524 = vrot.lane.b32.xlu0 %v518_v39, %s677_s10  ;;  %520 = vrot.lane.b32.xlu1 %v518_v39, %s676_s9 }
 0x850   :  { %v521_v41 = vpop.permute.xlu1 %520  ;;  %v525_v43 = vpop.permute.xlu0 %524 }
 0x851   :  { %v523_v42 = vadd.f32 %v521_v41, %v518_v39 }
 0x853   :  { %v527_v44 = vadd.f32 %v525_v43, %v523_v42 }
 0x855   :  { %v528_v45 = vmul.f32 0.33333334, %v527_v44 }
 0x857   :  { %530 = vst.msk [vmem:[#allocation2] sm:$0x3] %vm529_vm7, %v528_v45 }
 0x858   :  { %631 = shalt.err (!%p628_p4)
}
 0x859   :  { %540 = dma.vmem_to_hbm [thread:$0]  %s538_s12, 32, %s817_s2, [#allocation3]  }
 0x85a   :  { %640 = dma.done.wait [#allocation3], 32  }
 0x85b   :  { %641 = vsyncadd [#allocation3], 4294967264 }
 0x85c   :  { %544 = vsyncpa [#allocation3], 1 }

</bundles_post_ra>
